<compile_context>
chip_gen: v5e
topology: v5e:2x2
jax: 0.10.0
libtpu: 0.0.40
codegen_flags: <defaults>
</compile_context>

<pallas_src>
import jax
import jax.numpy as jnp
from jax.experimental import pallas as pl
from jax.experimental.pallas import tpu as pltpu


_TARGET_BLOCK_BYTES = 2 * 1024 * 1024   # ~2 MiB/block; 2 in + 2 out buffers ~= 8 MiB


def _identity_kernel(x_ref, o_ref):
    # Pure copy of the resident block: forward(x) = x.
    o_ref[...] = x_ref[...]


def _pick_lanes(n):
    """Largest lane-dense width (multiple of 128) that divides n exactly."""
    for c in (4096, 2048, 1024, 512, 256, 128):
        if n % c == 0:
            return c
    return None


def _pick_rows(n_rows, n_lanes, itemsize):
    """Row tile: multiple of the dtype's sublane packing, ~2 MiB per block."""
    sub = max(8, 32 // itemsize)          # 8 for f32, 16 for bf16, 32 for int8/fp8
    tr = (_TARGET_BLOCK_BYTES // (n_lanes * itemsize)) // sub * sub
    tr = max(sub, tr)
    return min(tr, n_rows)                # full first dim is always legal


def _copy_2d(x2):
    r, c = x2.shape
    tr = _pick_rows(r, c, x2.dtype.itemsize)
    return pl.pallas_call(
        _identity_kernel,
        out_shape=jax.ShapeDtypeStruct((r, c), x2.dtype),
        grid=(pl.cdiv(r, tr),),
        in_specs=[pl.BlockSpec((tr, c), lambda i: (i, 0))],
        out_specs=pl.BlockSpec((tr, c), lambda i: (i, 0)),
        input_output_aliases={0: 0},      # identity: output aliases input buffer
        cost_estimate=pl.CostEstimate(
            flops=0, transcendentals=0,
            bytes_accessed=2 * x2.size * x2.dtype.itemsize),
        compiler_params=pltpu.CompilerParams(
            dimension_semantics=("parallel",),
            vmem_limit_bytes=32 * 1024 * 1024),
    )(x2)


@jax.jit
def identity(x):
    """Identity forward pass (y = x) via a lane-dense Pallas copy kernel."""
    orig_shape = x.shape
    n = int(x.size)
    if n == 0:
        return x                           # nothing to move

    lanes = _pick_lanes(n)
    if lanes is not None:
        # Fast path: pure-metadata reshape to a lane-dense 2D slab, aliased copy.
        x2 = x.reshape(n // lanes, lanes)
        return _copy_2d(x2).reshape(orig_shape)

    # Fallback (element count not a multiple of 128): pad the flat buffer to a
    # lane-dense width, copy, slice back. Semantics stay exact.
    lanes = 128
    pad = (-n) % lanes
    xf = jnp.pad(x.reshape(-1), (0, pad))
    out = _copy_2d(xf.reshape(-1, lanes))
    return out.reshape(-1)[:n].reshape(orig_shape)


if __name__ == "__main__":
    key = jax.random.PRNGKey(0)

    # Small NCHW input consistent with a typical conv-net forward.
    x = jax.random.normal(key, (2, 4, 16, 16), dtype=jnp.float32)
    y = identity(x)
    jax.block_until_ready(y)
    assert y.shape == x.shape
    assert y.dtype == x.dtype
    assert bool(jnp.all(y == x))

    # Odd-sized input exercising the padded fallback path.
    x_odd = jax.random.normal(jax.random.PRNGKey(0), (3, 5, 7), dtype=jnp.float32)
    y_odd = identity(x_odd)
    jax.block_until_ready(y_odd)
    assert y_odd.shape == x_odd.shape
    assert y_odd.dtype == x_odd.dtype
    assert bool(jnp.all(y_odd == x_odd))

    print("KERNEL_OK")
</pallas_src>

<mosaic_0001>
module attributes {stable_mosaic.version = 11 : i64} {
  func.func @_identity_kernel(%arg0: i32, %arg1: memref<1x2048xf32, #tpu.memory_space<vmem>>, %arg2: memref<1x2048xf32, #tpu.memory_space<vmem>>) attributes {dimension_semantics = [#tpu.dimension_semantics<parallel>], iteration_bounds = array<i64: 1>, scalar_prefetch = 0 : i64, scratch_operands = 0 : i64, tpu.core_type = #tpu.core_type<tc>, window_params = [{transform_indices = @transform_0, window_bounds = array<i64: 1, 2048>}, {transform_indices = @transform_1, window_bounds = array<i64: 1, 2048>}]} {
    %c0 = arith.constant 0 : index
    %c0_0 = arith.constant 0 : index
    %0 = vector.load %arg1[%c0, %c0_0] : memref<1x2048xf32, #tpu.memory_space<vmem>>, vector<1x2048xf32>
    %c0_1 = arith.constant 0 : index
    %c0_2 = arith.constant 0 : index
    %1 = vector.load %arg2[%c0_1, %c0_2] : memref<1x2048xf32, #tpu.memory_space<vmem>>, vector<1x2048xf32>
    tpu.vector_store %arg2[%c0_1, %c0_2], %0 {strides = array<i32>} : memref<1x2048xf32, #tpu.memory_space<vmem>>, vector<1x2048xf32>,
    return
  }
  func.func @transform_0(%arg0: i32) -> (i32, i32) {
    %c0_i32 = arith.constant 0 : i32
    %c0_i32_0 = arith.constant 0 : i32
    return %arg0, %c0_i32 : i32, i32
  }
  func.func @transform_1(%arg0: i32) -> (i32, i32) {
    %c0_i32 = arith.constant 0 : i32
    %c0_i32_0 = arith.constant 0 : i32
    return %arg0, %c0_i32 : i32, i32
  }
}

</mosaic_0001>

<bundles_post_ra>
// kernel: identity.1
= control target key start
LH: loop header
LB: loop body
LE: loop exit
PB: predicated region body
PF: predicated region fallthrough
CT: control target
= control target key end

     0   :  { %s38_s0 = inlined_call_operand.vmem [shape: f32[1,2048], index: 0, kind: input, shape index: {}, may-alias: {0,1}]   ;;  %s39_s1 = inlined_call_operand.vmem [shape: f32[1,2048], index: 1, kind: output, shape index: {}, may-alias: {0,1}]  }
   0x1   :  { %v8_v0 = vld [vmem:[%s38_s0] sm:$0xff]  ;;  %v9_v1 = vld [vmem:[%s38_s0 + $0x8] sm:$0xff] }
   0x2   :  { %10 = vst [vmem:[%s39_s1] sm:$0xff] %v8_v0 }
   0x3   :  { %11 = vst [vmem:[%s39_s1 + $0x8] sm:$0xff] %v9_v1 }

</bundles_post_ra>
